<compile_context>
chip_gen: v7x
topology: tpu7x:2x2x1
jax: 0.10.0
libtpu: 0.0.40
codegen_flags: <defaults>
</compile_context>

<pallas_src>
import functools

import jax
import jax.numpy as jnp
from jax import lax
from jax.experimental import pallas as pl
from jax.experimental.pallas import tpu as pltpu

# ---- problem sizes (small, consistent with the module's constructor) ----
B_ROWS = 256    # batch of edges (rows of edge_feats / node_attrs)
A_DIM = 4       # num_elements        (node_attrs one-hot width)
E_DIM = 8       # num_edge_feats      (radial basis width)
K_DIM = 128     # num_feats_out       (lane-dense output width)


def _pick_block_b(b: int) -> int:
    """Largest row tile that amortizes per-step overhead while keeping the
    grid length >= 2 (so both v7x TensorCores get work; no-op on v5e/v6e)."""
    for cand in (1024, 512, 256, 128, 64, 32, 16, 8):
        if b >= 2 * cand:
            return cand
    return 8


def _selection_matrices(a_dim: int, e_dim: int, dtype=jnp.float32):
    """Constant selection matrices on the merged [*, A+E] operand.

      (combo @ s_a)[b, a*E+e] = node_attrs[b, a]
      (combo @ s_e)[b, a*E+e] = edge_feats[b, e]
    """
    ae = a_dim * e_dim
    rows = jnp.arange(a_dim + e_dim)[:, None]            # [A+E, 1]
    cols = jnp.arange(ae)[None, :]                       # [1, A*E]
    s_a = ((rows < a_dim) & ((cols // e_dim) == rows)).astype(dtype)
    s_e = ((rows >= a_dim) & ((cols % e_dim) == (rows - a_dim))).astype(dtype)
    return s_a, s_e                                       # each [A+E, A*E]


def _tp_weights_kernel(combo_ref, s_a_ref, s_e_ref, w_ref, out_ref,
                       *, compute_dtype):
    """One batch tile: out = ((combo @ S_a) * (combo @ S_e)) @ W_flat."""
    f32 = jnp.float32
    combo = combo_ref[...]                                        # [TB, A+E]

    # Fused (a,e) outer product via two tiny MXU selection matmuls
    # (operands are exact 0/1, so this stage is exact in any dtype).
    na_exp = jnp.dot(combo, s_a_ref[...], preferred_element_type=f32)
    ef_exp = jnp.dot(combo, s_e_ref[...], preferred_element_type=f32)
    x = (na_exp * ef_exp).astype(compute_dtype)                   # [TB, A*E]

    # Single 128-wide-output MXU contraction, f32 accumulation.
    out_ref[...] = jnp.dot(x, w_ref[...],
                           preferred_element_type=f32).astype(out_ref.dtype)


def tensor_product_weights_block(node_attrs, edge_feats, weights, *,
                                 block_b=None, use_bf16_matmul=False,
                                 out_dtype=jnp.float32):
    """Pallas forward of TensorProductWeightsBlock.

    node_attrs: [B, A]  edge_feats: [B, E]  weights: [A, E, K]  -> [B, K]
    """
    b, a_dim = node_attrs.shape
    b2, e_dim = edge_feats.shape
    assert b == b2, "node_attrs / edge_feats batch mismatch"
    wa, we, k_dim = weights.shape
    assert (wa, we) == (a_dim, e_dim), "weights shape mismatch"

    if block_b is None:
        block_b = _pick_block_b(b)

    compute_dtype = jnp.bfloat16 if use_bf16_matmul else jnp.float32
    ae = a_dim * e_dim

    # Merge the two lane-sparse activation streams into one [B, A+E] operand.
    combo = jnp.concatenate(
        [node_attrs.astype(jnp.float32), edge_feats.astype(jnp.float32)],
        axis=1)                                                   # [B, A+E]

    w_flat = weights.reshape(ae, k_dim).astype(compute_dtype)     # [A*E, K]
    s_a, s_e = _selection_matrices(a_dim, e_dim, jnp.float32)     # [A+E, A*E]

    grid = (pl.cdiv(b, block_b),)   # no padding: tail block is partial/masked
    kernel = functools.partial(_tp_weights_kernel, compute_dtype=compute_dtype)

    out = pl.pallas_call(
        kernel,
        grid=grid,
        in_specs=[
            pl.BlockSpec((block_b, a_dim + e_dim), lambda i: (i, 0)),  # tiled rows
            pl.BlockSpec((a_dim + e_dim, ae), lambda i: (0, 0)),       # resident
            pl.BlockSpec((a_dim + e_dim, ae), lambda i: (0, 0)),       # resident
            pl.BlockSpec((ae, k_dim), lambda i: (0, 0)),               # resident
        ],
        out_specs=pl.BlockSpec((block_b, k_dim), lambda i: (i, 0)),    # lane-dense
        out_shape=jax.ShapeDtypeStruct((b, k_dim), out_dtype),
        compiler_params=pltpu.CompilerParams(
            dimension_semantics=("parallel",)),                        # 2 TCs on v7x
    )(combo, s_a, s_e, w_flat)

    return out


def tensor_product_weights_reference(node_attrs, edge_feats, weights):
    """Pure-JAX reference: torch.einsum('be, ba, aek -> bk', ...)."""
    return jnp.einsum('be,ba,aek->bk', edge_feats, node_attrs, weights,
                      precision=lax.Precision.HIGHEST)


def make_weights(key, a_dim, e_dim, k_dim):
    # Xavier-uniform on a [A, E, K] tensor (torch convention for this shape:
    # fan_in = E*K, fan_out = A*K).
    fan_in = e_dim * k_dim
    fan_out = a_dim * k_dim
    bound = (6.0 / (fan_in + fan_out)) ** 0.5
    return jax.random.uniform(key, (a_dim, e_dim, k_dim), jnp.float32,
                              minval=-bound, maxval=bound)


if __name__ == "__main__":
    key = jax.random.PRNGKey(0)
    k_types, k_ef, k_w = jax.random.split(key, 3)

    # node_attrs at each edge row: one-hot element type (as in MACE).
    types = jax.random.randint(k_types, (B_ROWS,), 0, A_DIM)
    node_attrs = jax.nn.one_hot(types, A_DIM, dtype=jnp.float32)        # [B, A]
    edge_feats = jax.random.normal(k_ef, (B_ROWS, E_DIM), jnp.float32)  # [B, E]
    weights = make_weights(k_w, A_DIM, E_DIM, K_DIM)                    # [A, E, K]

    out = tensor_product_weights_block(node_attrs, edge_feats, weights)
    out = jax.block_until_ready(out)

    ref = tensor_product_weights_reference(node_attrs, edge_feats, weights)
    assert out.shape == (B_ROWS, K_DIM)
    assert jnp.allclose(out, ref, atol=1e-4, rtol=1e-4), "mismatch vs reference"

    print("KERNEL_OK")
</pallas_src>

<mosaic_0001>
module attributes {stable_mosaic.version = 11 : i64} {
  func.func @_tp_weights_kernel(%arg0: i32, %arg1: memref<128x12xf32, #tpu.memory_space<vmem>>, %arg2: memref<12x32xf32, #tpu.memory_space<vmem>>, %arg3: memref<12x32xf32, #tpu.memory_space<vmem>>, %arg4: memref<32x128xf32, #tpu.memory_space<vmem>>, %arg5: memref<128x128xf32, #tpu.memory_space<vmem>>) attributes {dimension_semantics = [#tpu.dimension_semantics<parallel>], iteration_bounds = array<i64: 2>, scalar_prefetch = 0 : i64, scratch_operands = 0 : i64, tpu.core_type = #tpu.core_type<tc>, window_params = [{transform_indices = @transform_0, window_bounds = array<i64: 128, 12>}, {pipeline_mode = #tpu.pipeline_mode<synchronous>, transform_indices = @transform_1, window_bounds = array<i64: 12, 32>}, {pipeline_mode = #tpu.pipeline_mode<synchronous>, transform_indices = @transform_2, window_bounds = array<i64: 12, 32>}, {pipeline_mode = #tpu.pipeline_mode<synchronous>, transform_indices = @transform_3, window_bounds = array<i64: 32, 128>}, {transform_indices = @transform_4, window_bounds = array<i64: 128, 128>}]} {
    %c0 = arith.constant 0 : index
    %c0_0 = arith.constant 0 : index
    %0 = vector.load %arg1[%c0, %c0_0] : memref<128x12xf32, #tpu.memory_space<vmem>>, vector<128x12xf32>
    %c0_1 = arith.constant 0 : index
    %c0_2 = arith.constant 0 : index
    %1 = vector.load %arg2[%c0_1, %c0_2] : memref<12x32xf32, #tpu.memory_space<vmem>>, vector<12x32xf32>
    %cst = arith.constant dense<0.000000e+00> : vector<128x32xf32>
    %2 = tpu.matmul %0, %1, %cst {dimension_numbers = #tpu.dot_dimension_numbers<[1], [0], [0], [1], [0, 0, 1, 1], [], []>} : vector<128x12xf32>, vector<12x32xf32>, vector<128x32xf32> -> vector<128x32xf32>
    %c0_3 = arith.constant 0 : index
    %c0_4 = arith.constant 0 : index
    %3 = vector.load %arg3[%c0_3, %c0_4] : memref<12x32xf32, #tpu.memory_space<vmem>>, vector<12x32xf32>
    %cst_5 = arith.constant dense<0.000000e+00> : vector<128x32xf32>
    %4 = tpu.matmul %0, %3, %cst_5 {dimension_numbers = #tpu.dot_dimension_numbers<[1], [0], [0], [1], [0, 0, 1, 1], [], []>} : vector<128x12xf32>, vector<12x32xf32>, vector<128x32xf32> -> vector<128x32xf32>
    %5 = arith.mulf %2, %4 : vector<128x32xf32>
    %c0_6 = arith.constant 0 : index
    %c0_7 = arith.constant 0 : index
    %6 = vector.load %arg4[%c0_6, %c0_7] : memref<32x128xf32, #tpu.memory_space<vmem>>, vector<32x128xf32>
    %cst_8 = arith.constant dense<0.000000e+00> : vector<128x128xf32>
    %7 = tpu.matmul %5, %6, %cst_8 {dimension_numbers = #tpu.dot_dimension_numbers<[1], [0], [0], [1], [0, 0, 1, 1], [], []>} : vector<128x32xf32>, vector<32x128xf32>, vector<128x128xf32> -> vector<128x128xf32>
    %c0_9 = arith.constant 0 : index
    %c0_10 = arith.constant 0 : index
    %8 = vector.load %arg5[%c0_9, %c0_10] : memref<128x128xf32, #tpu.memory_space<vmem>>, vector<128x128xf32>
    tpu.vector_store %arg5[%c0_9, %c0_10], %7 {strides = array<i32>} : memref<128x128xf32, #tpu.memory_space<vmem>>, vector<128x128xf32>,
    return
  }
  func.func @transform_0(%arg0: i32) -> (i32, i32) {
    %c0_i32 = arith.constant 0 : i32
    %c0_i32_0 = arith.constant 0 : i32
    return %arg0, %c0_i32 : i32, i32
  }
  func.func @transform_1(%arg0: i32) -> (i32, i32) {
    %c0_i32 = arith.constant 0 : i32
    %c0_i32_0 = arith.constant 0 : i32
    %c0_i32_1 = arith.constant 0 : i32
    return %c0_i32, %c0_i32_0 : i32, i32
  }
  func.func @transform_2(%arg0: i32) -> (i32, i32) {
    %c0_i32 = arith.constant 0 : i32
    %c0_i32_0 = arith.constant 0 : i32
    %c0_i32_1 = arith.constant 0 : i32
    return %c0_i32, %c0_i32_0 : i32, i32
  }
  func.func @transform_3(%arg0: i32) -> (i32, i32) {
    %c0_i32 = arith.constant 0 : i32
    %c0_i32_0 = arith.constant 0 : i32
    %c0_i32_1 = arith.constant 0 : i32
    return %c0_i32, %c0_i32_0 : i32, i32
  }
  func.func @transform_4(%arg0: i32) -> (i32, i32) {
    %c0_i32 = arith.constant 0 : i32
    %c0_i32_0 = arith.constant 0 : i32
    return %arg0, %c0_i32 : i32, i32
  }
}

</mosaic_0001>

<bundles_post_ra>
// kernel: tpu_custom_call.1
= control target key start
LH: loop header
LB: loop body
LE: loop exit
PB: predicated region body
PF: predicated region fallthrough
CT: control target
= control target key end

     0   :  { %9 = vsyncpa [#allocation3], 0  ;;  %s1466_s0 = inlined_call_operand.vmem [shape: f32[256,12], index: 0, kind: input, shape index: {}]   ;;  %s1467_s1 = inlined_call_operand.vmem [shape: f32[12,32], index: 1, kind: input, shape index: {}]   ;;  %s1468_s2 = inlined_call_operand.vmem [shape: f32[12,32], index: 2, kind: input, shape index: {}]   ;;  %s1469_s3 = inlined_call_operand.vmem [shape: f32[32,128], index: 3, kind: input, shape index: {}]   ;;  %s1470_s4 = inlined_call_operand.hbm [shape: f32[256,128], index: 4, kind: output, shape index: {}]  }
   0x1   :  { %11 = vsyncpa [#allocation3 + $0x1], 0  ;;  %s1235_s15 = smov 0   ;;  %s1237_s16 = smov 0  }
   0x2   :  { %s1239_s17 = smov 0   ;;  %s1241_s18 = smov 0  }
   0x3 LB: > { %s1256_s19 = sadd.s32 4294967295, %s1204_s18   ;;  %s871_s20 = sadd.s32 4294967294, %s1204_s18   ;;  %s1204_s18 = sphi %s1241_s18, %s1478_s18   ;;  %s1200_s17 = sphi %s1239_s17, %s1477_s17   ;;  %s1196_s16 = sphi %s1237_s16, %s1476_s16   ;;  %s1192_s15 = sphi %s1235_s15, %s1475_s15  }
   0x4   : > { %s1260_s21 = sadd.s32 1, %s1204_s18   ;;  %s113_s22 = sadd.s32 1, %s1200_s17 }
   0x5   : > { %s110_s23 = ssub.s32 %s1204_s18, %s1260_s21  ;;  %p123_p0 = scmp.ne.s32.totalorder %s1200_s17, %s1196_s16 }
   0x6   : > { %p111_p1 = scmp.eq.s32.totalorder %s110_s23, 0  ;;  %p124_p2 = scmp.eq.s32.totalorder %s1256_s19, 1 }
   0x7   : > { %p129_p3 = scmp.ne.s32.totalorder %s1196_s16, %s1192_s15  ;;  %p130_p4 = scmp.eq.s32.totalorder %s871_s20, 1 }
   0x8   : > { %s1271_s24 = scalar_select %p111_p1, %s1200_s17, %s113_s22  }
   0x9   : > { %p1273_p5 = por %p124_p2, %p123_p0  ;;  %p1277_p6 = por %p130_p4, %p129_p3 }
   0xa   : > { %p874_p7 = scmp.ge.s32.totalorder %s1204_s18, 1  ;;  %p166_p8 = scmp.lt.s32.totalorder %s1204_s18, 3 }
   0xc   : > { %p167_p9 = pnand %p874_p7, %p166_p8 }
   0xd   : > { %v215_v0 = vld [vmem:[%s1467_s1] sm:$0xff] (!%p167_p9)  ;;  %v216_v1 = vld [vmem:[%s1467_s1 + $0x8] sm:$0xf] (!%p167_p9)  ;;  %vm266_vm0 = vcmask (!%p167_p9), 1043456   ;;  %s876_s5 = sshll.u32 (!%p167_p9), %s1256_s19, 4  ;;  %vm1206_vm1 = vmmov (!%p167_p9), 1  }
   0xe   : > { %170 = sbr.rel (%p167_p9) target bundleno = 514 (0x202), region = 36  ;;  %v1078_v2 = vpack.c.bf16 (!%p167_p9), %v216_v1, %v215_v0  ;;  %vm1290_vm2 = vmpackc.low (!%p167_p9), %vm266_vm0, %vm1206_vm1  ;;  %p193_p10 = scmp.lt.s32.totalorder (!%p167_p9), %s876_s5, 31  ;;  %v415_v4 = vld [vmem:[%s1468_s2] sm:$0xff] (!%p167_p9)  ;;  %v416_v5 = vld [vmem:[%s1468_s2 + $0x8] sm:$0xf] (!%p167_p9)  ;;  %vm217_vm3 = vcmask (!%p167_p9), 97280  }
   0xf   : > { %v1084_v6 = vpack.c.bf16 (!%p167_p9), %v416_v5, %v415_v4  ;;  %v581_v23 = vld [vmem:[%s1469_s3] sm:$0xff] (!%p167_p9)  ;;  %v582_v24 = vld [vmem:[%s1469_s3 + $0x8] sm:$0xff] (!%p167_p9)  ;;  %v583_v26 = vld [vmem:[%s1469_s3 + $0x10] sm:$0xff] (!%p167_p9)  ;;  %vm585_vm4 = vcmask (!%p167_p9), 261120   ;;  %s933_s8 = sshll.u32 (!%p167_p9), %s1256_s19, 11  ;;  %s1207_s14 = smov (!%p167_p9), [#allocation2]  }
  0x10   : > { %1098 = vmatprep.subr.msk.bf16.mxu1 (!%p167_p9), %vm1290_vm2, %v1078_v2  ;;  %1080 = vmatprep.subr.msk.bf16.mxu0 (!%p167_p9), %vm1290_vm2, %v1078_v2  ;;  %v1090_v25 = vpack.c.bf16 (!%p167_p9), %v582_v24, %v581_v23  ;;  %v584_v27 = vld [vmem:[%s1469_s3 + $0x18] sm:$0xff] (!%p167_p9)  ;;  %s1417_s12 = scalar_lea.hbm (!%p167_p9), %s1470_s4, %s933_s8  ;;  %s1146_s20 = sshll.u32 (!%p167_p9), %s1207_s14, 4  ;;  %s1147_s20 = int_to_ptr.vmem [resolvable:$false] %s1146_s20 }
  0x11   : > { %1099 = vmatpush3.bf16.msk.msra.mxu1 (!%p167_p9), %vm1290_vm2, %v1078_v2  ;;  %1083 = vmatpush3.bf16.msk.msra.mxu0 (!%p167_p9), %vm1290_vm2, %v1078_v2  ;;  %v1094_v28 = vpack.c.bf16 (!%p167_p9), %v584_v27, %v583_v26  ;;  %s1148_s22 = scalar_lea.vmem (!%p167_p9), %s1147_s20, 4096 }
  0x12   : > { %1086 = vmatprep.subr.msk.bf16.mxu1 (!%p167_p9), %vm1290_vm2, %v1084_v6  ;;  %1091 = vmatprep.subr.bf16.mxu0 (!%p167_p9), %v1090_v25 }
  0x15   : > { %s1480_s5 = smov (!%p193_p10, %s876_s5), 31 }
  0x16   : > { %s877_s10 = sshll.u32 %s1480_s5, 3  ;;  %s189_s5 = sand.u32 1, %s1196_s16  }
  0x17   : > { %s1313_s13 = scalar_lea.vmem %s1466_s0, %s877_s10  ;;  %s875_s6 = sshll.u32 %s189_s5, 7 }
  0x18   : > { %v207_v7 = vld [vmem:[%s1313_s13 + $0x40] sm:$0xff]  ;;  %v208_v8 = vld [vmem:[%s1313_s13 + $0x48] sm:$0xff]  ;;  %v209_v9 = vld [vmem:[%s1313_s13 + $0x50] sm:$0xff]  ;;  %s1396_s7 = scalar_lea.vmem [#allocation2], %s875_s6  ;;  %s1425_s19 = scalar_lea.sflag [#allocation3], %s189_s5 }
  0x19   : > { %1006 = vmatprep.mubr.msk.f32.mxu1 %vm217_vm3, %v207_v7  ;;  %v199_v10 = vld [vmem:[%s1313_s13] sm:$0xff]  ;;  %v210_v11 = vld [vmem:[%s1313_s13 + $0x58] sm:$0xff]  ;;  %v200_v12 = vld [vmem:[%s1313_s13 + $0x8] sm:$0xff]  ;;  %s809_s9 = sshll.u32 %s1396_s7, 4  ;;  %s1419_s9 = int_to_ptr.vmem [resolvable:$true] %s809_s9 }
  0x1a   : > { %1007 = vmatmul.mubr.msk.f32.vlgmr.msra.gmra.mrb[0].mxu1 %vm217_vm3, %v208_v8  ;;  %v201_v13 = vld [vmem:[%s1313_s13 + $0x10] sm:$0xff]  ;;  %v211_v14 = vld [vmem:[%s1313_s13 + $0x60] sm:$0xff]  ;;  %994 = vmatprep.mubr.msk.f32.mxu0 %vm217_vm3, %v199_v10  ;;  %v202_v15 = vld [vmem:[%s1313_s13 + $0x18] sm:$0xff]  ;;  %p1149_p0 = scmp.lt.s32.totalorder %s1419_s9, %s1147_s20 }
  0x1b   : > { %1089 = vmatpush3.bf16.msk.msra.mxu1 %vm1290_vm2, %v1084_v6  ;;  %1009 = vmatprep.mubr.msk.f32.mxu1 %vm217_vm3, %v209_v9  ;;  %v212_v16 = vld [vmem:[%s1313_s13 + $0x68] sm:$0xff]  ;;  %v203_v17 = vld [vmem:[%s1313_s13 + $0x20] sm:$0xff]  ;;  %v213_v18 = vld [vmem:[%s1313_s13 + $0x70] sm:$0xff] }
  0x1c   : > { %995 = vmatmul.mubr.msk.f32.vlgmr.msra.gmra.mrb[0].mxu0 %vm217_vm3, %v200_v12  ;;  %v204_v19 = vld [vmem:[%s1313_s13 + $0x28] sm:$0xff]  ;;  %v214_v20 = vld [vmem:[%s1313_s13 + $0x78] sm:$0xff]  ;;  %v205_v21 = vld [vmem:[%s1313_s13 + $0x30] sm:$0xff] }
  0x1d   : > { %997 = vmatprep.mubr.msk.f32.mxu0 %vm217_vm3, %v201_v13  ;;  %v206_v22 = vld [vmem:[%s1313_s13 + $0x38] sm:$0xff]  ;;  %1093 = vmatpush3.bf16.msra.mxu0 %v1090_v25  ;;  %s1142_s13 = scalar_lea.vmem %s1419_s9, 2048 }
  0x1e   : > { %1010 = vmatmul.mubr.msk.f32.gmra.mrb[2].mxu1 %vm217_vm3, %v210_v11  ;;  %1095 = vmatprep.subr.bf16.mxu0 %v1094_v28  ;;  %p1143_p11 = scmp.ne.s32.totalorder %s1419_s9, %s1142_s13  ;;  %p1150_p1 = scmp.lt.s32.totalorder %s1148_s22, %s1142_s13 }
  0x1f   : > { %1012 = vmatprep.mubr.msk.f32.mxu1 %vm217_vm3, %v211_v14 }
  0x20   : > { %998 = vmatmul.mubr.msk.f32.gmra.mrb[2].mxu0 %vm217_vm3, %v202_v15  ;;  %p1144_p12 = pnand %p1143_p11, %p1273_p5  ;;  %p1151_p2 = por %p1150_p1, %p1149_p0 }
  0x21   : > { %1000 = vmatprep.mubr.msk.f32.mxu0 %vm217_vm3, %v203_v17  ;;  %1097 = vmatpush3.bf16.msra.mxu0 %v1094_v28 }
  0x22   : > { %1013 = vmatmul.mubr.msk.f32.gmra.mrb[4].mxu1 %vm217_vm3, %v212_v16  ;;  %p1145_p13 = pneg %p1144_p12 }
  0x23   : > { %1015 = vmatprep.mubr.msk.f32.mxu1 %vm217_vm3, %v213_v18 }
  0x24   : > { %1001 = vmatmul.mubr.msk.f32.gmra.mrb[4].mxu0 %vm217_vm3, %v204_v19  ;;  %p1152_p3 = pnand %p1151_p2, %p1145_p13 }
  0x25   : > { %1003 = vmatprep.mubr.msk.f32.mxu0 %vm217_vm3, %v205_v21 }
  0x26   : > { %1016 = vmatmul.mubr.msk.f32.gmra.mrb[6].mxu1 %vm217_vm3, %v214_v20 }
  0x27   : > { %1022 = vmatprep.mubr.msk.f32.mxu1 %vm217_vm3, %v199_v10 }
  0x28   : > { %1004 = vmatmul.mubr.msk.f32.gmra.mrb[6].mxu0 %vm217_vm3, %v206_v22 }
  0x2a   : > { %1023 = vmatmul.mubr.msk.f32.vlgmr.msra.gmra.mrb[8].mxu1 %vm217_vm3, %v200_v12 }
  0x2b   : > { %1025 = vmatprep.mubr.msk.f32.mxu1 %vm217_vm3, %v201_v13 }
  0x2e   : > { %1026 = vmatmul.mubr.msk.f32.gmra.mrb[10].mxu1 %vm217_vm3, %v202_v15 }
  0x2f   : > { %1028 = vmatprep.mubr.msk.f32.mxu1 %vm217_vm3, %v203_v17 }
  0x32   : > { %1029 = vmatmul.mubr.msk.f32.gmra.mrb[12].mxu1 %vm217_vm3, %v204_v19 }
  0x33   : > { %1031 = vmatprep.mubr.msk.f32.mxu1 %vm217_vm3, %v205_v21 }
  0x36   : > { %1032 = vmatmul.mubr.msk.f32.gmra.mrb[14].mxu1 %vm217_vm3, %v206_v22 }
  0x37   : > { %1034 = vmatprep.mubr.msk.f32.mxu1 %vm217_vm3, %v207_v7 }
  0x3a   : > { %1035 = vmatmul.mubr.msk.f32.gmra.mrb[16].mxu1 %vm217_vm3, %v208_v8 }
  0x3b   : > { %1037 = vmatprep.mubr.msk.f32.mxu1 %vm217_vm3, %v209_v9 }
  0x3e   : > { %1038 = vmatmul.mubr.msk.f32.gmra.mrb[18].mxu1 %vm217_vm3, %v210_v11 }
  0x3f   : > { %1040 = vmatprep.mubr.msk.f32.mxu1 %vm217_vm3, %v211_v14 }
  0x42   : > { %1041 = vmatmul.mubr.msk.f32.gmra.mrb[20].mxu1 %vm217_vm3, %v212_v16 }
  0x43   : > { %1043 = vmatprep.mubr.msk.f32.mxu1 %vm217_vm3, %v213_v18 }
  0x46   : > { %1044 = vmatmul.mubr.msk.f32.gmra.mrb[22].mxu1 %vm217_vm3, %v214_v20 }
  0xed   : > { %v1008_v29 = vpop.f32.mrb[0].mxu1 }
  0xee   : > { %v376_v30 = vpop.f32.mrb[1].mxu1 }
  0xef   : > { %v996_v31 = vpop.f32.mrb[0].mxu0 }
  0xf0   : > { %v336_v33 = vpop.f32.mrb[1].mxu0 }
  0xf1   : > { %v1011_v32 = vpop.f32.mrb[2].mxu1 }
  0xf2   : > { %v386_v34 = vpop.f32.mrb[3].mxu1 }
  0xf3   : > { %v999_v35 = vpop.f32.mrb[2].mxu0 }
  0xf4   : > { %v346_v37 = vpop.f32.mrb[3].mxu0 }
  0xf5   : > { %v1014_v36 = vpop.f32.mrb[4].mxu1 }
  0xf6   : > { %v396_v38 = vpop.f32.mrb[5].mxu1 }
  0xf7   : > { %v1002_v39 = vpop.f32.mrb[4].mxu0 }
  0xf8   : > { %v356_v41 = vpop.f32.mrb[5].mxu0 }
  0xf9   : > { %v1017_v40 = vpop.f32.mrb[6].mxu1 }
  0xfa   : > { %v406_v42 = vpop.f32.mrb[7].mxu1 }
  0xfb   : > { %v1005_v43 = vpop.f32.mrb[6].mxu0 }
  0xfc   : > { %v366_v45 = vpop.f32.mrb[7].mxu0 }
  0xfd   : > { %v1024_v44 = vpop.f32.mrb[8].mxu1 }
  0xfe   : > { %v566_v46 = vmul.f32 %v1024_v44, %v996_v31  ;;  %v486_v47 = vpop.f32.mrb[9].mxu1 }
  0xff   : > { %v565_v48 = vmul.f32 %v486_v47, %v336_v33 }
 0x101   : > { %v1027_v49 = vpop.f32.mrb[10].mxu1  ;;  %1054 = vmatprep.mubr.msk.f32.mxu0 %vm585_vm4, %v565_v48 }
 0x102   : > { %v568_v50 = vmul.f32 %v1027_v49, %v999_v35  ;;  %v496_v51 = vpop.f32.mrb[11].mxu1  ;;  %1055 = vmatmul.mubr.msk.f32.vlgmr.msra.gmra.mrb[8].mxu0 %vm585_vm4, %v566_v46 }
 0x103   : > { %v567_v52 = vmul.f32 %v496_v51, %v346_v37 }
 0x105   : > { %v1030_v53 = vpop.f32.mrb[12].mxu1  ;;  %1057 = vmatprep.mubr.msk.f32.mxu0 %vm585_vm4, %v567_v52 }
 0x106   : > { %v570_v54 = vmul.f32 %v1030_v53, %v1002_v39  ;;  %v506_v55 = vpop.f32.mrb[13].mxu1  ;;  %1058 = vmatmul.mubr.msk.f32.gmra.mrb[10].mxu0 %vm585_vm4, %v568_v50 }
 0x107   : > { %v569_v56 = vmul.f32 %v506_v55, %v356_v41 }
 0x109   : > { %v1033_v57 = vpop.f32.mrb[14].mxu1  ;;  %1060 = vmatprep.mubr.msk.f32.mxu0 %vm585_vm4, %v569_v56 }
 0x10a   : > { %v572_v58 = vmul.f32 %v1033_v57, %v1005_v43  ;;  %v516_v59 = vpop.f32.mrb[15].mxu1  ;;  %1061 = vmatmul.mubr.msk.f32.gmra.mrb[12].mxu0 %vm585_vm4, %v570_v54 }
 0x10b   : > { %v571_v60 = vmul.f32 %v516_v59, %v366_v45 }
 0x10d   : > { %v1036_v61 = vpop.f32.mrb[16].mxu1  ;;  %1063 = vmatprep.mubr.msk.f32.mxu0 %vm585_vm4, %v571_v60 }
 0x10e   : > { %v574_v62 = vmul.f32 %v1036_v61, %v1008_v29  ;;  %v526_v63 = vpop.f32.mrb[17].mxu1  ;;  %1064 = vmatmul.mubr.msk.f32.gmra.mrb[14].mxu0 %vm585_vm4, %v572_v58 }
 0x10f   : > { %v573_v0 = vmul.f32 %v526_v63, %v376_v30 }
 0x111   : > { %v1039_v1 = vpop.f32.mrb[18].mxu1  ;;  %1066 = vmatprep.mubr.msk.f32.mxu0 %vm585_vm4, %v573_v0 }
 0x112   : > { %v576_v2 = vmul.f32 %v1039_v1, %v1011_v32  ;;  %v536_v3 = vpop.f32.mrb[19].mxu1  ;;  %1067 = vmatmul.mubr.msk.f32.gmra.mrb[16].mxu0 %vm585_vm4, %v574_v62 }
 0x113   : > { %v575_v4 = vmul.f32 %v536_v3, %v386_v34 }
 0x115   : > { %v1042_v5 = vpop.f32.mrb[20].mxu1  ;;  %1069 = vmatprep.mubr.msk.f32.mxu0 %vm585_vm4, %v575_v4 }
 0x116   : > { %v578_v6 = vmul.f32 %v1042_v5, %v1014_v36  ;;  %v546_v7 = vpop.f32.mrb[21].mxu1  ;;  %1070 = vmatmul.mubr.msk.f32.gmra.mrb[18].mxu0 %vm585_vm4, %v576_v2 }
 0x117   : > { %v577_v8 = vmul.f32 %v546_v7, %v396_v38 }
 0x119   : > { %v1045_v9 = vpop.f32.mrb[22].mxu1  ;;  %1072 = vmatprep.mubr.msk.f32.mxu0 %vm585_vm4, %v577_v8 }
 0x11a   : > { %v580_v10 = vmul.f32 %v1045_v9, %v1017_v40  ;;  %v556_v11 = vpop.f32.mrb[23].mxu1  ;;  %1073 = vmatmul.mubr.msk.f32.gmra.mrb[20].mxu0 %vm585_vm4, %v578_v6 }
 0x11b   : > { %v579_v12 = vmul.f32 %v556_v11, %v406_v42 }
 0x11d   : > { %1075 = vmatprep.mubr.msk.f32.mxu0 %vm585_vm4, %v579_v12 }
 0x11e   : > { %1076 = vmatmul.mubr.msk.f32.gmra.mrb[22].mxu0 %vm585_vm4, %v580_v10 }
 0x1d5   : > { %v1056_v13 = vpop.f32.mrb[8].mxu0 }
 0x1d6   : > { %780 = vst [vmem:[%s1396_s7 + $0x8] sm:$0xff] %v1056_v13  ;;  %v700_v14 = vpop.f32.mrb[9].mxu0 }
 0x1d7   : > { %779 = vst [vmem:[%s1396_s7] sm:$0xff] %v700_v14 }
 0x1d9   : > { %v1059_v15 = vpop.f32.mrb[10].mxu0 }
 0x1da   : > { %782 = vst [vmem:[%s1396_s7 + $0x18] sm:$0xff] %v1059_v15  ;;  %v710_v16 = vpop.f32.mrb[11].mxu0 }
 0x1db   : > { %781 = vst [vmem:[%s1396_s7 + $0x10] sm:$0xff] %v710_v16 }
 0x1dd   : > { %v1062_v17 = vpop.f32.mrb[12].mxu0 }
 0x1de   : > { %784 = vst [vmem:[%s1396_s7 + $0x28] sm:$0xff] %v1062_v17  ;;  %v720_v18 = vpop.f32.mrb[13].mxu0 }
 0x1df   : > { %783 = vst [vmem:[%s1396_s7 + $0x20] sm:$0xff] %v720_v18 }
 0x1e1   : > { %v1065_v19 = vpop.f32.mrb[14].mxu0 }
 0x1e2   : > { %786 = vst [vmem:[%s1396_s7 + $0x38] sm:$0xff] %v1065_v19  ;;  %v730_v20 = vpop.f32.mrb[15].mxu0 }
 0x1e3   : > { %785 = vst [vmem:[%s1396_s7 + $0x30] sm:$0xff] %v730_v20 }
 0x1e5   : > { %v1068_v21 = vpop.f32.mrb[16].mxu0 }
 0x1e6   : > { %788 = vst [vmem:[%s1396_s7 + $0x48] sm:$0xff] %v1068_v21  ;;  %v740_v22 = vpop.f32.mrb[17].mxu0 }
 0x1e7   : > { %787 = vst [vmem:[%s1396_s7 + $0x40] sm:$0xff] %v740_v22 }
 0x1e9   : > { %v1071_v23 = vpop.f32.mrb[18].mxu0 }
 0x1ea   : > { %790 = vst [vmem:[%s1396_s7 + $0x58] sm:$0xff] %v1071_v23  ;;  %v750_v24 = vpop.f32.mrb[19].mxu0 }
 0x1eb   : > { %789 = vst [vmem:[%s1396_s7 + $0x50] sm:$0xff] %v750_v24 }
 0x1ed   : > { %v1074_v25 = vpop.f32.mrb[20].mxu0 }
 0x1ee   : > { %792 = vst [vmem:[%s1396_s7 + $0x68] sm:$0xff] %v1074_v25  ;;  %v760_v26 = vpop.f32.mrb[21].mxu0 }
 0x1ef   : > { %791 = vst [vmem:[%s1396_s7 + $0x60] sm:$0xff] %v760_v26 }
 0x1f1   : > { %v1077_v27 = vpop.f32.mrb[22].mxu0 }
 0x1f2   : > { %794 = vst [vmem:[%s1396_s7 + $0x78] sm:$0xff] %v1077_v27  ;;  %v770_v28 = vpop.f32.mrb[23].mxu0 }
 0x1f3   : > { %793 = vst [vmem:[%s1396_s7 + $0x70] sm:$0xff] %v770_v28 }
 0x1f4   : > { %1155 = shalt.err (!%p1152_p3)
}
 0x1f5   : > { %s1156_s23 = scalar_lea.hbm %s1417_s12, 2048  ;;  %s1160_s29 = scalar_lea.hbm %s1470_s4, 4096 }
 0x1f6   : > { %p1157_p4 = scmp.ne.s32.totalorder %s1417_s12, %s1156_s23  ;;  %p1161_p9 = scmp.lt.u32.totalorder %s1417_s12, %s1470_s4 }
 0x1f7   : > { %p1162_p10 = scmp.lt.u32.totalorder %s1160_s29, %s1156_s23  ;;  %p1164_p12 = scmp.lt.u32.totalorder %s1156_s23, %s1417_s12 }
 0x1f8   : > { %p1158_p7 = pnand %p1157_p4, %p1273_p5 }
 0x1f9   : > { %p1163_p11 = por %p1162_p10, %p1161_p9 }
 0x1fa   : > { %p1159_p8 = pneg %p1158_p7 }
 0x1fb   : > { %p1165_p13 = por %p1164_p12, %p1163_p11 }
 0x1fd   : > { %p1166_p0 = pnand %p1165_p13, %p1159_p8 }
 0x1ff   : > { %1169 = shalt.err (!%p1166_p0)
}
 0x200   : > { %s1208_s6 = smov 128   ;;  %s1209_s7 = smov 8  }
 0x201   : > { %1100 = dma.vmem_to_hbm [thread:$0]  (%p1273_p5), %s1419_s9, 2048, %s1417_s12, %s1425_s19, %s1208_s6, %s1208_s6, %s1209_s7  }
 0x202 PF: > { %p1106_p1 = scmp.ge.s32.totalorder %s1204_s18, 2  ;;  %s824_s8 = sand.u32 1, %s1192_s15  }
 0x203   : > { %s825_s10 = scalar_lea.sflag [#allocation3], %s824_s8 }
 0x204   : > { %p1103_p2 = pnand %p1106_p1, %p1277_p6 }
 0x206   : > { %1187 = dma.done.wait (!%p1103_p2), %s825_s10, 2048  }
 0x207   : > { %1189 = vsyncadd (!%p1103_p2), %s825_s10, 4294965248  ;;  %p14_p3 = scmp.ge.s32.totalorder %s1260_s21, 4   ;;  %s1475_s15 = smov %s1196_s16 }
 0x208   : > { %s1476_s16 = smov %s1200_s17  ;;  %s1477_s17 = smov %s1271_s24 }
 0x209   : > { %s1478_s18 = smov %s1260_s21  ;;  %16 = sbr.rel (!%p14_p3) target bundleno = 3 (0x3), region = 71 }
 0x210   :  { %830 = vsyncpa [#allocation3], 1 }
 0x211   :  { %832 = vsyncpa [#allocation3 + $0x1], 1 }

</bundles_post_ra>
